<compile_context>
chip_gen: v6e
topology: v6e:2x2x1
jax: 0.10.0
libtpu: 0.0.40
codegen_flags: <defaults>
</compile_context>

<pallas_src>
import functools

import jax
import jax.numpy as jnp
from jax.experimental import pallas as pl
from jax.experimental.pallas import tpu as pltpu


def _round_up(n: int, m: int) -> int:
    return ((n + m - 1) // m) * m


def _layernorm_rows(z, gamma, beta, eps):
    """Row-wise LayerNorm over the last (lane) dim; single statistics pass, f32."""
    inv_d = jnp.float32(1.0 / z.shape[-1])
    mean = jnp.sum(z, axis=-1, keepdims=True) * inv_d
    mean_sq = jnp.sum(z * z, axis=-1, keepdims=True) * inv_d
    var = mean_sq - mean * mean              # E[z^2] - E[z]^2 (one pass)
    inv = jax.lax.rsqrt(var + jnp.float32(eps))
    return (z - mean) * (inv * gamma) + beta


def _add_norm_kernel(x_ref, y_ref, gamma_ref, beta_ref, o_ref, *, eps):
    x = x_ref[...].astype(jnp.float32)
    y = y_ref[...].astype(jnp.float32)
    gamma = gamma_ref[...].astype(jnp.float32)
    beta = beta_ref[...].astype(jnp.float32)
    o_ref[...] = _layernorm_rows(x + y, gamma, beta, eps).astype(o_ref.dtype)


def _add_norm_dropout_kernel(x_ref, y_ref, bits_ref, gamma_ref, beta_ref,
                             o_ref, *, rate, eps):
    x = x_ref[...].astype(jnp.float32)
    y = y_ref[...].astype(jnp.float32)
    gamma = gamma_ref[...].astype(jnp.float32)
    beta = beta_ref[...].astype(jnp.float32)
    # Inverted dropout via integer-threshold compare (P(drop) ~= rate).
    threshold = jnp.uint32(min(int(rate * 4294967296.0), 4294967295))
    scale = jnp.float32(1.0 / (1.0 - rate))
    y = jnp.where(bits_ref[...] >= threshold, y * scale, jnp.float32(0.0))
    o_ref[...] = _layernorm_rows(x + y, gamma, beta, eps).astype(o_ref.dtype)


def add_norm(x, y, gamma, beta, *, dropout_rate=0.0, eps=1e-5, rng_key=None,
             tile_rows=1024):
    """AddNorm: LayerNorm(dropout(Y) + X) over the last dim."""
    assert x.shape == y.shape
    orig_shape = x.shape
    D = orig_shape[-1]
    x2 = x.reshape(-1, D)
    y2 = y.reshape(-1, D)
    R = x2.shape[0]

    # Row tile: as large as practical (mem-bound kernel), multiple of the
    # sublane tiling (16 for bf16, 8 for f32), clamped to the array size.
    sublane = 16 if x2.dtype == jnp.bfloat16 else 8
    r_cap = _round_up(R, sublane)
    tile_rows = _round_up(min(max(int(tile_rows), sublane), r_cap), sublane)
    grid = (pl.cdiv(R, tile_rows),)

    gamma2 = gamma.reshape(1, D)
    beta2 = beta.reshape(1, D)

    row_spec = pl.BlockSpec((tile_rows, D), lambda i: (i, 0))
    param_spec = pl.BlockSpec((1, D), lambda i: (0, 0))

    training = float(dropout_rate) > 0.0

    # VMEM budget: x, y, out (+ uint32 bits in training), each double-buffered,
    # plus gamma/beta and headroom.  Keeps large tiles compiling on v5e's
    # 16 MiB scoped default while staying well inside v7x's 64 MiB physical.
    itemsize = x2.dtype.itemsize
    per_tile = tile_rows * D
    vmem_need = (2 * per_tile * (3 * itemsize + (4 if training else 0))
                 + 4 * D * 4 + (2 << 20))
    compiler_params = pltpu.CompilerParams(
        dimension_semantics=("parallel",),        # rows are fully independent
        vmem_limit_bytes=int(max(vmem_need, 16 << 20)),
    )

    if not training:
        out = pl.pallas_call(
            functools.partial(_add_norm_kernel, eps=float(eps)),
            out_shape=jax.ShapeDtypeStruct((R, D), x.dtype),
            grid=grid,
            in_specs=[row_spec, row_spec, param_spec, param_spec],
            out_specs=row_spec,
            compiler_params=compiler_params,
        )(x2, y2, gamma2, beta2)
    else:
        if rng_key is None:
            rng_key = jax.random.PRNGKey(0)
        bits = jax.random.bits(rng_key, (R, D), dtype=jnp.uint32)
        out = pl.pallas_call(
            functools.partial(_add_norm_dropout_kernel,
                              rate=float(dropout_rate), eps=float(eps)),
            out_shape=jax.ShapeDtypeStruct((R, D), x.dtype),
            grid=grid,
            in_specs=[row_spec, row_spec, row_spec, param_spec, param_spec],
            out_specs=row_spec,
            compiler_params=compiler_params,
        )(x2, y2, bits, gamma2, beta2)

    return out.reshape(orig_shape)


if __name__ == "__main__":
    B, S, D = 2, 8, 128  # batch, seq, hidden (normalized_shape = D)
    eps = 1e-5
    key = jax.random.PRNGKey(0)
    kx, ky = jax.random.split(key)
    x = jax.random.normal(kx, (B, S, D), dtype=jnp.float32)
    y = jax.random.normal(ky, (B, S, D), dtype=jnp.float32)

    # nn.LayerNorm default init.
    gamma = jnp.ones((D,), dtype=jnp.float32)
    beta = jnp.zeros((D,), dtype=jnp.float32)

    # --- Eval-mode path (dropout = identity) vs. pure-JAX reference. ---
    out_eval = add_norm(x, y, gamma, beta, dropout_rate=0.0, eps=eps)
    jax.block_until_ready(out_eval)
    z = x + y
    mean = jnp.mean(z, axis=-1, keepdims=True)
    var = jnp.mean((z - mean) ** 2, axis=-1, keepdims=True)
    ref = (z - mean) / jnp.sqrt(var + eps) * gamma + beta
    assert jnp.max(jnp.abs(out_eval - ref)) < 1e-3, "eval-mode mismatch"

    # --- Training-mode path (dropout on Y) vs. reference with same mask. ---
    rate = 0.5
    drop_key = jax.random.PRNGKey(1234)
    out_train = add_norm(x, y, gamma, beta, dropout_rate=rate, eps=eps,
                         rng_key=drop_key)
    jax.block_until_ready(out_train)

    bits = jax.random.bits(drop_key, (B * S, D), dtype=jnp.uint32)
    thr = jnp.uint32(min(int(rate * 4294967296.0), 4294967295))
    y_drop = jnp.where(bits >= thr,
                       y.reshape(-1, D) * (1.0 / (1.0 - rate)), 0.0)
    z2 = y_drop + x.reshape(-1, D)
    mean2 = jnp.mean(z2, axis=-1, keepdims=True)
    var2 = jnp.mean((z2 - mean2) ** 2, axis=-1, keepdims=True)
    ref_train = ((z2 - mean2) / jnp.sqrt(var2 + eps) * gamma + beta
                 ).reshape(B, S, D)
    assert jnp.max(jnp.abs(out_train - ref_train)) < 1e-3, "train-mode mismatch"

    print("KERNEL_OK")
</pallas_src>

<mosaic_0001>
module attributes {stable_mosaic.version = 11 : i64} {
  func.func @_add_norm_kernel(%arg0: i32, %arg1: memref<16x128xf32, #tpu.memory_space<vmem>>, %arg2: memref<16x128xf32, #tpu.memory_space<vmem>>, %arg3: memref<1x128xf32, #tpu.memory_space<vmem>>, %arg4: memref<1x128xf32, #tpu.memory_space<vmem>>, %arg5: memref<16x128xf32, #tpu.memory_space<vmem>>) attributes {dimension_semantics = [#tpu.dimension_semantics<parallel>], iteration_bounds = array<i64: 1>, scalar_prefetch = 0 : i64, scratch_operands = 0 : i64, tpu.core_type = #tpu.core_type<tc>, window_params = [{transform_indices = @transform_0, window_bounds = array<i64: 16, 128>}, {transform_indices = @transform_1, window_bounds = array<i64: 16, 128>}, {pipeline_mode = #tpu.pipeline_mode<synchronous>, transform_indices = @transform_2, window_bounds = array<i64: 1, 128>}, {pipeline_mode = #tpu.pipeline_mode<synchronous>, transform_indices = @transform_3, window_bounds = array<i64: 1, 128>}, {transform_indices = @transform_4, window_bounds = array<i64: 16, 128>}]} {
    %c0 = arith.constant 0 : index
    %c0_0 = arith.constant 0 : index
    %0 = vector.load %arg1[%c0, %c0_0] : memref<16x128xf32, #tpu.memory_space<vmem>>, vector<16x128xf32>
    %c0_1 = arith.constant 0 : index
    %c0_2 = arith.constant 0 : index
    %1 = vector.load %arg2[%c0_1, %c0_2] : memref<16x128xf32, #tpu.memory_space<vmem>>, vector<16x128xf32>
    %c0_3 = arith.constant 0 : index
    %c0_4 = arith.constant 0 : index
    %2 = vector.load %arg3[%c0_3, %c0_4] : memref<1x128xf32, #tpu.memory_space<vmem>>, vector<1x128xf32>
    %c0_5 = arith.constant 0 : index
    %c0_6 = arith.constant 0 : index
    %3 = vector.load %arg4[%c0_5, %c0_6] : memref<1x128xf32, #tpu.memory_space<vmem>>, vector<1x128xf32>
    %4 = arith.addf %0, %1 : vector<16x128xf32>
    %cst = arith.constant dense<0.000000e+00> : vector<16xf32>
    %5 = vector.multi_reduction <add>, %4, %cst [1] : vector<16x128xf32> to vector<16xf32>
    %6 = vector.shape_cast %5 : vector<16xf32> to vector<16x1xf32>
    %cst_7 = arith.constant 7.812500e-03 : f32
    %7 = vector.broadcast %cst_7 : f32 to vector<16x1xf32>
    %8 = arith.mulf %6, %7 : vector<16x1xf32>
    %9 = arith.mulf %4, %4 : vector<16x128xf32>
    %cst_8 = arith.constant dense<0.000000e+00> : vector<16xf32>
    %10 = vector.multi_reduction <add>, %9, %cst_8 [1] : vector<16x128xf32> to vector<16xf32>
    %11 = vector.shape_cast %10 : vector<16xf32> to vector<16x1xf32>
    %cst_9 = arith.constant 7.812500e-03 : f32
    %12 = vector.broadcast %cst_9 : f32 to vector<16x1xf32>
    %13 = arith.mulf %11, %12 : vector<16x1xf32>
    %14 = arith.mulf %8, %8 : vector<16x1xf32>
    %15 = arith.subf %13, %14 : vector<16x1xf32>
    %cst_10 = arith.constant 9.99999974E-6 : f32
    %16 = vector.broadcast %cst_10 : f32 to vector<16x1xf32>
    %17 = arith.addf %15, %16 : vector<16x1xf32>
    %18 = math.rsqrt %17 : vector<16x1xf32>
    %19 = vector.broadcast %8 : vector<16x1xf32> to vector<16x128xf32>
    %20 = arith.subf %4, %19 : vector<16x128xf32>
    %21 = vector.broadcast %18 : vector<16x1xf32> to vector<16x128xf32>
    %22 = vector.broadcast %2 : vector<1x128xf32> to vector<16x128xf32>
    %23 = arith.mulf %21, %22 : vector<16x128xf32>
    %24 = arith.mulf %20, %23 : vector<16x128xf32>
    %25 = vector.broadcast %3 : vector<1x128xf32> to vector<16x128xf32>
    %26 = arith.addf %24, %25 : vector<16x128xf32>
    %c0_11 = arith.constant 0 : index
    %c0_12 = arith.constant 0 : index
    %27 = vector.load %arg5[%c0_11, %c0_12] : memref<16x128xf32, #tpu.memory_space<vmem>>, vector<16x128xf32>
    tpu.vector_store %arg5[%c0_11, %c0_12], %26 {strides = array<i32>} : memref<16x128xf32, #tpu.memory_space<vmem>>, vector<16x128xf32>,
    return
  }
  func.func @transform_0(%arg0: i32) -> (i32, i32) {
    %c0_i32 = arith.constant 0 : i32
    %c0_i32_0 = arith.constant 0 : i32
    return %arg0, %c0_i32 : i32, i32
  }
  func.func @transform_1(%arg0: i32) -> (i32, i32) {
    %c0_i32 = arith.constant 0 : i32
    %c0_i32_0 = arith.constant 0 : i32
    return %arg0, %c0_i32 : i32, i32
  }
  func.func @transform_2(%arg0: i32) -> (i32, i32) {
    %c0_i32 = arith.constant 0 : i32
    %c0_i32_0 = arith.constant 0 : i32
    %c0_i32_1 = arith.constant 0 : i32
    return %c0_i32, %c0_i32_0 : i32, i32
  }
  func.func @transform_3(%arg0: i32) -> (i32, i32) {
    %c0_i32 = arith.constant 0 : i32
    %c0_i32_0 = arith.constant 0 : i32
    %c0_i32_1 = arith.constant 0 : i32
    return %c0_i32, %c0_i32_0 : i32, i32
  }
  func.func @transform_4(%arg0: i32) -> (i32, i32) {
    %c0_i32 = arith.constant 0 : i32
    %c0_i32_0 = arith.constant 0 : i32
    return %arg0, %c0_i32 : i32, i32
  }
}

</mosaic_0001>

<bundles_post_ra>
// kernel: tpu_custom_call.1
= control target key start
LH: loop header
LB: loop body
LE: loop exit
PB: predicated region body
PF: predicated region fallthrough
CT: control target
= control target key end

     0   :  { %9 = vsyncpa [#allocation3], 0  ;;  %s247_s0 = inlined_call_operand.hbm [shape: f32[16,128], index: 0, kind: input, shape index: {}]   ;;  %s248_s1 = inlined_call_operand.hbm [shape: f32[16,128], index: 1, kind: input, shape index: {}]   ;;  %s249_s2 = inlined_call_operand.vmem [shape: f32[1,128], index: 2, kind: input, shape index: {}]   ;;  %s250_s3 = inlined_call_operand.vmem [shape: f32[1,128], index: 3, kind: input, shape index: {}]   ;;  %s251_s4 = inlined_call_operand.hbm [shape: f32[16,128], index: 4, kind: output, shape index: {}]  }
   0x1   :  { %10 = vsyncpa [#allocation6], 0 }
   0x2   :  { %11 = vsyncpa [#allocation4], 0  ;;  %s193_s15 = smov [#allocation2]  }
   0x3   :  { %s17_s16 = sshll.u32 %s193_s15, 4  ;;  %s18_s16 = int_to_ptr.vmem [resolvable:$true] %s17_s16 }
   0x4   :  { %s135_s17 = scalar_lea.vmem %s18_s16, 256  ;;  %p140_p1 = scmp.lt.s32.totalorder %s18_s16, %s18_s16 }
   0x5   :  { %p136_p0 = scmp.ne.s32.totalorder %s18_s16, %s135_s17  ;;  %p141_p2 = scmp.lt.s32.totalorder %s135_s17, %s135_s17 }
   0x7   :  { %p142_p3 = por %p141_p2, %p140_p1 }
   0x9   :  { %p143_p4 = pnand %p142_p3, %p136_p0 }
   0xb   :  { %146 = shalt.err (!%p143_p4)
}
   0xc   :  { %s194_s18 = smov 128   ;;  %s195_s19 = smov 8  }
   0xd   :  { %23 = dma.hbm_to_vmem [thread:$0]  %s247_s0, 256, %s18_s16, [#allocation3], %s194_s18, %s194_s18, %s195_s19  }
   0xe   :  { %s196_s22 = smov [#allocation5]  }
   0xf   :  { %s29_s23 = sshll.u32 %s196_s22, 4  ;;  %s30_s23 = int_to_ptr.vmem [resolvable:$true] %s29_s23 }
  0x10   :  { %s155_s24 = scalar_lea.vmem %s30_s23, 256  ;;  %p160_p6 = scmp.lt.s32.totalorder %s30_s23, %s30_s23 }
  0x11   :  { %p156_p5 = scmp.ne.s32.totalorder %s30_s23, %s155_s24  ;;  %p161_p7 = scmp.lt.s32.totalorder %s155_s24, %s155_s24 }
  0x13   :  { %p162_p8 = por %p161_p7, %p160_p6 }
  0x15   :  { %p163_p9 = pnand %p162_p8, %p156_p5 }
  0x17   :  { %166 = shalt.err (!%p163_p9)
}
  0x18   :  { %35 = dma.hbm_to_vmem [thread:$0]  %s248_s1, 256, %s30_s23, [#allocation6], %s194_s18, %s194_s18, %s195_s19  }
  0x19   :  { %187 = dma.done.wait [#allocation3], 256  }
  0x1a   :  { %188 = vsyncadd [#allocation3], 4294967040 }
  0x1b   :  { %189 = dma.done.wait [#allocation6], 256  }
  0x1c   :  { %190 = vsyncadd [#allocation6], 4294967040  ;;  %v46_v0 = vld [vmem:[#allocation2] sm:$0xff]  ;;  %v48_v1 = vld [vmem:[#allocation5] sm:$0xff]  ;;  %s197_s29 = smov [#allocation7]  }
  0x1d   :  { %v47_v2 = vld [vmem:[#allocation2 + $0x8] sm:$0xff]  ;;  %v52_v3 = vadd.f32 %v48_v1, %v46_v0  ;;  %v49_v4 = vld [vmem:[#allocation5 + $0x8] sm:$0xff]  ;;  %v116_v22 = vld [vmem:[%s249_s2] ss:$0 sm:$0xff]  ;;  %s103_s30 = sshll.u32 %s197_s29, 4  ;;  %s104_s30 = int_to_ptr.vmem [resolvable:$true] %s103_s30 }
  0x1e   :  { %v53_v5 = vadd.f32 %v49_v4, %v47_v2  ;;  %v117_v26 = vld [vmem:[%s250_s3] ss:$0 sm:$0xff]  ;;  %s167_s2 = scalar_lea.vmem %s104_s30, 256  ;;  %p172_p11 = scmp.lt.s32.totalorder %s104_s30, %s104_s30 }
  0x1f   :  { %54 = vadd.xlane.f32.xlu0 %v52_v3  ;;  %v60_v6 = vmul.f32 %v52_v3, %v52_v3  ;;  %p168_p10 = scmp.ne.s32.totalorder %s104_s30, %s167_s2  ;;  %p173_p12 = scmp.lt.s32.totalorder %s167_s2, %s167_s2 }
  0x20   :  { %v61_v7 = vmul.f32 %v53_v5, %v53_v5 }
  0x21   :  { %62 = vadd.xlane.f32.xlu1 %v60_v6  ;;  %p174_p13 = por %p173_p12, %p172_p11 }
  0x23   :  { %56 = vadd.xlane.f32.xlu0 %v53_v5  ;;  %p175_p0 = pnand %p174_p13, %p168_p10 }
  0x25   :  { %64 = vadd.xlane.f32.xlu1 %v61_v7 }
  0xa8   :  { %v55_v8 = vpop.xlane.xlu0 %54 }
  0xa9   :  { %v58_v9 = vmul.f32 0.0078125, %v55_v8 }
  0xaa   :  { %v63_v10 = vpop.xlane.xlu1 %62 }
  0xab   :  { %v68_v11 = vmul.f32 %v58_v9, %v58_v9  ;;  %v66_v12 = vmul.f32 0.0078125, %v63_v10  ;;  %v76_v24 = vsub.f32 %v52_v3, %v58_v9 }
  0xac   :  { %v57_v13 = vpop.xlane.xlu0 %56 }
  0xad   :  { %v70_v14 = vsub.f32 %v66_v12, %v68_v11  ;;  %v59_v15 = vmul.f32 0.0078125, %v57_v13 }
  0xae   :  { %v65_v16 = vpop.xlane.xlu1 %64 }
  0xaf   :  { %v72_v17 = vadd.f32 1e-05, %v70_v14  ;;  %v69_v18 = vmul.f32 %v59_v15, %v59_v15  ;;  %v67_v19 = vmul.f32 0.0078125, %v65_v16  ;;  %v77_v29 = vsub.f32 %v53_v5, %v59_v15 }
  0xb1   :  { %123 = vrsqrt.f32 %v72_v17  ;;  %v71_v20 = vsub.f32 %v67_v19, %v69_v18 }
  0xb3   :  { %v73_v21 = vadd.f32 1e-05, %v71_v20 }
  0xb5   :  { %125 = vrsqrt.f32 %v73_v21 }
  0xbe   :  { %v124_v23 = vpop.eup %123 }
  0xbf   :  { %v84_v25 = vmul.f32 %v124_v23, %v116_v22 }
  0xc1   :  { %v86_v27 = vmul.f32 %v84_v25, %v76_v24 }
  0xc2   :  { %v126_v28 = vpop.eup %125 }
  0xc3   :  { %v85_v30 = vmul.f32 %v126_v28, %v116_v22  ;;  %v94_v31 = vadd.f32 %v117_v26, %v86_v27 }
  0xc5   :  { %v87_v32 = vmul.f32 %v85_v30, %v77_v29  ;;  %96 = vst [vmem:[#allocation7] sm:$0xff] %v94_v31 }
  0xc7   :  { %v95_v33 = vadd.f32 %v117_v26, %v87_v32 }
  0xc9   :  { %97 = vst [vmem:[#allocation7 + $0x8] sm:$0xff] %v95_v33 }
  0xca   :  { %178 = shalt.err (!%p175_p0)
}
  0xcb   :  { %109 = dma.vmem_to_hbm [thread:$0]  %s104_s30, 256, %s251_s4, [#allocation4], %s194_s18, %s194_s18, %s195_s19  }
  0xcc   :  { %191 = dma.done.wait [#allocation4], 256  }
  0xcd   :  { %192 = vsyncadd [#allocation4], 4294967040 }
  0xce   :  { %113 = vsyncpa [#allocation3], 1 }
  0xcf   :  { %114 = vsyncpa [#allocation6], 1 }
  0xd0   :  { %115 = vsyncpa [#allocation4], 1 }

</bundles_post_ra>
